<compile_context>
chip_gen: v6e
topology: v6e:2x2x1
jax: 0.10.0
libtpu: 0.0.40
codegen_flags: <defaults>
</compile_context>

<pallas_src>
import functools

import numpy as np
import jax
import jax.numpy as jnp
from jax.experimental import pallas as pl
from jax.experimental.pallas import tpu as pltpu


# ----------------------------------------------------------------------------
# Pallas kernel: one (padded) image per grid step, weights resident.
# ----------------------------------------------------------------------------
def dmp_kernel(counts_ref,                       # SMEM [imgs, 2] int32 (n, r) — scalar prefetch
               src_ref, dst_ref,                 # VMEM [1, R, 1] int32
               obj_ref, union_ref,               # VMEM [1, N, D] / [1, R, D] f32
               prj_w, prj_b,                     # fused [ws | wo | wt3]: [D, 2.5D], [1, 2.5D]
               wu_w, wu_b,                       # wu pre-scaled column-wise by Linear(D,1).weight
               w_b,                              # [1, 1] bias of Linear(D, 1)
               t1_top, t1_bot, t1_b,             # trans[0] split: [D//2, D//4] x2 + [1, D//4]
               ln_g, ln_b, t2_w, t2_b,
               out_ref,                          # VMEM [1, N, D] f32
               *, compute_dtype):
    f32 = jnp.float32
    cdt = compute_dtype
    approx_recip = bool(jnp.dtype(cdt) == jnp.dtype(jnp.bfloat16))

    img = pl.program_id(0)
    n = counts_ref[img, 0]                       # true number of objects in this image

    obj32 = obj_ref[0]                           # [N, D] f32 (padded rows are zero)
    union = union_ref[0]                         # [R, D] f32 (padded rows are zero)
    src = src_ref[0]                             # [R, 1] int32 (padded pairs are (0,0))
    dst = dst_ref[0]                             # [R, 1] int32

    N, D = obj32.shape
    R = union.shape[0]

    def mm(a, b):                                # MXU matmul, cdt operands, f32 accumulate
        return jnp.dot(a.astype(cdt), b.astype(cdt), preferred_element_type=f32)

    def mm_t(a, b):                              # a.T @ b without materializing a transpose
        return jax.lax.dot_general(
            a.astype(cdt), b.astype(cdt),
            dimension_numbers=(((0,), (0,)), ((), ())),
            preferred_element_type=f32)

    # ---- fused obj-side projections: ws(obj) | wo(obj) | W_t3(obj) in one MXU pass ----
    big = mm(obj32, prj_w[...]) + prj_b[...]     # [N, 2.5*D]
    hs_all = big[:, :D]                          # ws(obj_feat)        [N, D]
    ho_all = big[:, D:2 * D]                     # wo(obj_feat)        [N, D]
    wt3 = jnp.maximum(big[:, 2 * D:], 0.0)       # relu(W_t3(obj))     [N, D//2]

    hu = mm(union, wu_w[...]) + wu_b[...]        # [R, D] (Linear(D,1) weight pre-folded in)

    # ---- gather-as-matmul: one-hot selection matrices (exact in bf16) ----
    col = jax.lax.broadcasted_iota(jnp.int32, (R, N), 1)
    S = (col == src).astype(cdt)                 # [R, N] subject one-hot
    O = (col == dst).astype(cdt)                 # [R, N] object  one-hot
    hs = mm(S, hs_all)                           # ws(obj)[pair[:, 0]]   [R, D]
    ho = mm(O, ho_all)                           # wo(obj)[pair[:, 1]]   [R, D]

    # attention coefficient: Linear(D,1) is a VPU product + lane reduction (w folded into wu)
    coeff = jnp.sum(hs * ho * hu, axis=-1, keepdims=True) + w_b[...]     # [R, 1] f32

    # ---- scatter: atten[s, o] += coeff  ==  S^T @ (coeff * O)   (no explicit S.T) ----
    atten = mm_t(S, coeff * O.astype(f32))                               # [N, N] f32

    # sigmoid, mask diagonal + padded rows/cols, row-normalize (padded rows stay 0)
    row_i = jax.lax.broadcasted_iota(jnp.int32, (N, N), 0)
    col_i = jax.lax.broadcasted_iota(jnp.int32, (N, N), 1)
    valid = (row_i != col_i) & (row_i < n) & (col_i < n)
    atten = jnp.where(valid, jax.nn.sigmoid(atten), 0.0)
    denom = jnp.sum(atten, axis=1, keepdims=True)
    denom = jnp.where(denom > 0.0, denom, 1.0)                           # guards padded rows
    atten = atten * pl.reciprocal(denom, approx=approx_recip)

    # context + trans Linear(D, D//4): push t1 through W_t3 first so the two N x N
    # matmuls run at width D//4 instead of D//2; no concat, no explicit atten.T.
    p_fwd = mm(wt3, t1_top[...])                                         # [N, D//4]
    p_bwd = mm(wt3, t1_bot[...])                                         # [N, D//4]
    h = mm(atten, p_fwd) + mm_t(atten, p_bwd) + t1_b[...]                # [N, D//4]

    # LayerNorm (f32 epilogue) + ReLU + Linear(D//4, D)
    mu = jnp.mean(h, axis=-1, keepdims=True)
    var = jnp.mean(jnp.square(h - mu), axis=-1, keepdims=True)
    h = (h - mu) * jax.lax.rsqrt(var + 1e-5) * ln_g[...] + ln_b[...]
    h = jnp.maximum(h, 0.0)
    nb = mm(h, t2_w[...]) + t2_b[...]                                    # [N, D]

    out_ref[0] = jnp.maximum(obj32 + nb, 0.0).astype(out_ref.dtype)


# ----------------------------------------------------------------------------
# Wrappers
# ----------------------------------------------------------------------------
def _cost_estimate(imgs, n, r, d):
    flops_img = (
        2 * n * d * (2 * d + d // 2)             # fused ws|wo|wt3 projection
        + 2 * r * d * d                          # wu (w folded in)
        + 2 * (2 * r * n * d)                    # one-hot gathers
        + 3 * r * d                              # coeff product + lane reduction
        + 2 * n * n * r                          # attention scatter
        + 2 * (2 * n * (d // 2) * (d // 4))      # wt3 @ t1_top / t1_bot
        + 2 * (2 * n * n * (d // 4))             # atten @ p_fwd, atten^T @ p_bwd
        + 2 * n * (d // 4) * d)                  # t2
    trans_img = n * n + 2 * n                    # sigmoid + rsqrt + reciprocal
    bytes_w = 4 * (d * (2 * d + d // 2) + d * d + 2 * (d // 2) * (d // 4)
                   + (d // 4) * d + 6 * d + 2)
    bytes_img = 4 * (2 * n * d + r * d + 2 * r)
    return pl.CostEstimate(flops=imgs * flops_img,
                           transcendentals=imgs * trans_img,
                           bytes_accessed=bytes_w + imgs * bytes_img)


def dmp_forward_batched(counts, src_b, dst_b, obj_b, union_b, params,
                        *, compute_dtype=jnp.float32):
    """One gridded pallas_call over all (padded) images."""
    imgs, n_max, d = obj_b.shape
    r_max = union_b.shape[1]

    cast = lambda w: w.astype(compute_dtype)     # weights in MXU dtype, biases stay f32
    ws_w, ws_b = params["ws"]
    wo_w, wo_b = params["wo"]
    wu_w, wu_b = params["wu"]
    w_w, w_b = params["w"]
    wt3_w, wt3_b = params["wt3"]
    t1_w, t1_b = params["t1"]

    # Fold the Linear(D, 1) weight column-wise into wu (exact algebraic fold).
    w_col = w_w[:, 0][None, :]                   # [1, D]
    wu_w_f = wu_w * w_col
    wu_b_f = wu_b * w_col

    # Fuse the three obj-side projections into one wide matmul weight.
    prj_w = jnp.concatenate([ws_w, wo_w, wt3_w], axis=1)     # [D, 2.5*D]
    prj_b = jnp.concatenate([ws_b, wo_b, wt3_b], axis=1)     # [1, 2.5*D]

    weights = [
        cast(prj_w), prj_b,
        cast(wu_w_f), wu_b_f,
        w_b.reshape(1, 1),
        cast(t1_w[: d // 2]), cast(t1_w[d // 2:]), t1_b,
        params["ln"][0], params["ln"][1],
        cast(params["t2"][0]), params["t2"][1],
    ]

    per_img = lambda i, c: (i, 0, 0)             # c = scalar-prefetch (counts) ref
    resident = lambda i, c: (0, 0)               # same block every step -> DMA'd once

    grid_spec = pltpu.PrefetchScalarGridSpec(
        num_scalar_prefetch=1,
        grid=(imgs,),
        in_specs=[
            pl.BlockSpec((1, r_max, 1), per_img),        # src
            pl.BlockSpec((1, r_max, 1), per_img),        # dst
            pl.BlockSpec((1, n_max, d), per_img),        # obj
            pl.BlockSpec((1, r_max, d), per_img),        # union
        ] + [pl.BlockSpec(w.shape, resident) for w in weights],
        out_specs=pl.BlockSpec((1, n_max, d), per_img),
    )

    return pl.pallas_call(
        functools.partial(dmp_kernel, compute_dtype=compute_dtype),
        grid_spec=grid_spec,
        out_shape=jax.ShapeDtypeStruct((imgs, n_max, d), jnp.float32),
        compiler_params=pltpu.CompilerParams(dimension_semantics=("parallel",)),
        cost_estimate=_cost_estimate(imgs, n_max, r_max, d),
    )(counts, src_b, dst_b, obj_b, union_b, *weights)


@functools.lru_cache(maxsize=None)
def _batched_fn(compute_dtype):
    return jax.jit(functools.partial(dmp_forward_batched, compute_dtype=compute_dtype))


def _round_up8(x):
    return max(8, -(-x // 8) * 8)


def pad_inputs(obj_feats, union_feats, rel_pair_idxes, num_objs, num_rels):
    """Pad each image to (N_max, R_max) and stack; padded pairs map to the diagonal."""
    imgs = len(num_objs)
    d = obj_feats.shape[1]
    n_max = _round_up8(max(num_objs))
    r_max = _round_up8(max(num_rels))

    obj_np = np.asarray(obj_feats, np.float32)
    uni_np = np.asarray(union_feats, np.float32)

    obj_b = np.zeros((imgs, n_max, d), np.float32)
    uni_b = np.zeros((imgs, r_max, d), np.float32)
    src_b = np.zeros((imgs, r_max, 1), np.int32)
    dst_b = np.zeros((imgs, r_max, 1), np.int32)
    o = u = 0
    for i, (n, r) in enumerate(zip(num_objs, num_rels)):
        obj_b[i, :n] = obj_np[o:o + n]
        uni_b[i, :r] = uni_np[u:u + r]
        pairs = np.asarray(rel_pair_idxes[i], np.int32)
        src_b[i, :r, 0] = pairs[:, 0]
        dst_b[i, :r, 0] = pairs[:, 1]
        o += n
        u += r
    counts = np.array([[n, r] for n, r in zip(num_objs, num_rels)], np.int32)
    return (jnp.asarray(counts), jnp.asarray(src_b), jnp.asarray(dst_b),
            jnp.asarray(obj_b), jnp.asarray(uni_b))


def dmp_forward(obj_feats, union_feats, rel_pair_idxes, num_objs, num_rels, params,
                compute_dtype=jnp.float32):
    """Full forward: pad + batch all images into one gridded kernel, then unpad."""
    counts, src_b, dst_b, obj_b, uni_b = pad_inputs(
        obj_feats, union_feats, rel_pair_idxes, num_objs, num_rels)
    out_b = _batched_fn(compute_dtype)(counts, src_b, dst_b, obj_b, uni_b, params)
    return jnp.concatenate([out_b[i, :n] for i, n in enumerate(num_objs)], axis=0)


# ----------------------------------------------------------------------------
# Parameter init (deterministic, synthetic) and pure-JAX reference
# ----------------------------------------------------------------------------
def init_params(key, D):
    def lin(k, din, dout, scale=0.1):
        kw, kb = jax.random.split(k)
        return (jax.random.normal(kw, (din, dout), jnp.float32) * scale,
                jax.random.normal(kb, (1, dout), jnp.float32) * scale)

    ks = jax.random.split(key, 8)
    return {
        "ws":  lin(ks[0], D, D),
        "wo":  lin(ks[1], D, D),
        "wu":  lin(ks[2], D, D),
        "w":   lin(ks[3], D, 1),
        "wt3": lin(ks[4], D, D // 2),
        "t1":  lin(ks[5], D, D // 4),
        "ln":  (jnp.ones((1, D // 4), jnp.float32), jnp.zeros((1, D // 4), jnp.float32)),
        "t2":  lin(ks[6], D // 4, D),
    }
    # TODO(synk): project_input exists in the PyTorch module but is never used in forward().


def ref_forward_image(obj, union, pair, params):
    def lin(x, p):
        return x @ p[0] + p[1]

    N = obj.shape[0]
    sub = obj[pair[:, 0]]
    oo = obj[pair[:, 1]]
    coeff = lin(lin(sub, params["ws"]) * lin(oo, params["wo"])
                * lin(union, params["wu"]), params["w"])                       # [R, 1]
    atten = jnp.zeros((N, N), jnp.float32).at[pair[:, 0], pair[:, 1]].add(coeff[:, 0])
    atten = jax.nn.sigmoid(atten) * (1.0 - jnp.eye(N))
    atten = atten / atten.sum(axis=1, keepdims=True)
    wt3 = jax.nn.relu(lin(obj, params["wt3"]))
    ctx = jnp.concatenate([atten @ wt3, atten.T @ wt3], axis=-1)
    h = lin(ctx, params["t1"])
    mu = h.mean(-1, keepdims=True)
    var = ((h - mu) ** 2).mean(-1, keepdims=True)
    h = (h - mu) * jax.lax.rsqrt(var + 1e-5) * params["ln"][0] + params["ln"][1]
    nb = lin(jax.nn.relu(h), params["t2"])
    return jax.nn.relu(obj + nb)


def make_pairs(key, n, r):
    """r unique off-diagonal (subject, object) index pairs for n objects."""
    idx = jnp.array([(i, j) for i in range(n) for j in range(n) if i != j], jnp.int32)
    perm = jax.random.permutation(key, idx.shape[0])
    return idx[perm[:r]]


# ----------------------------------------------------------------------------
if __name__ == "__main__":
    key = jax.random.PRNGKey(0)
    D = 128                      # roi_dim (multiple of 128 -> lane-dense output)
    num_objs = [6, 5]            # objects per image
    num_rels = [12, 8]           # relations per image

    k_param, k_obj, k_uni, k_p0, k_p1 = jax.random.split(key, 5)
    params = init_params(k_param, D)
    obj_feats = jax.random.normal(k_obj, (sum(num_objs), D), jnp.float32)
    union_feats = jax.random.normal(k_uni, (sum(num_rels), D), jnp.float32)
    rel_pair_idxes = [make_pairs(k_p0, num_objs[0], num_rels[0]),
                      make_pairs(k_p1, num_objs[1], num_rels[1])]

    # Pure-JAX reference (matches the PyTorch module op-for-op).
    refs = []
    o_off = u_off = 0
    for n, r, pairs in zip(num_objs, num_rels, rel_pair_idxes):
        refs.append(ref_forward_image(obj_feats[o_off:o_off + n],
                                      union_feats[u_off:u_off + r], pairs, params))
        o_off += n
        u_off += r
    ref = jnp.concatenate(refs, axis=0)

    # f32 compute path.  Tolerance allows for TPU default matmul precision plus the
    # algebraically-refactored coeff / context computations (one extra matmul
    # reassociation vs the reference order of operations).
    out = dmp_forward(obj_feats, union_feats, rel_pair_idxes, num_objs, num_rels,
                      params, compute_dtype=jnp.float32)
    out = jax.block_until_ready(out)
    assert out.shape == ref.shape
    err32 = float(jnp.max(jnp.abs(out - ref)))
    assert jnp.allclose(out, ref, atol=3e-2, rtol=3e-2), err32

    # bf16 MXU path (f32 accumulate) — looser check, guards gross semantic errors.
    out16 = dmp_forward(obj_feats, union_feats, rel_pair_idxes, num_objs, num_rels,
                        params, compute_dtype=jnp.bfloat16)
    out16 = jax.block_until_ready(out16)
    assert bool(jnp.all(jnp.isfinite(out16)))
    err16 = float(jnp.max(jnp.abs(out16 - ref)))
    assert err16 < 0.25, err16

    print("KERNEL_OK")
</pallas_src>

<mosaic_0001>
module attributes {stable_mosaic.version = 11 : i64} {
  func.func @dmp_kernel(%arg0: i32, %arg1: memref<2x2xi32, #tpu.memory_space<smem>>, %arg2: memref<1x16x1xi32, #tpu.memory_space<vmem>>, %arg3: memref<1x16x1xi32, #tpu.memory_space<vmem>>, %arg4: memref<1x8x128xf32, #tpu.memory_space<vmem>>, %arg5: memref<1x16x128xf32, #tpu.memory_space<vmem>>, %arg6: memref<128x320xf32, #tpu.memory_space<vmem>>, %arg7: memref<1x320xf32, #tpu.memory_space<vmem>>, %arg8: memref<128x128xf32, #tpu.memory_space<vmem>>, %arg9: memref<1x128xf32, #tpu.memory_space<vmem>>, %arg10: memref<1x1xf32, #tpu.memory_space<vmem>>, %arg11: memref<64x32xf32, #tpu.memory_space<vmem>>, %arg12: memref<64x32xf32, #tpu.memory_space<vmem>>, %arg13: memref<1x32xf32, #tpu.memory_space<vmem>>, %arg14: memref<1x32xf32, #tpu.memory_space<vmem>>, %arg15: memref<1x32xf32, #tpu.memory_space<vmem>>, %arg16: memref<32x128xf32, #tpu.memory_space<vmem>>, %arg17: memref<1x128xf32, #tpu.memory_space<vmem>>, %arg18: memref<1x8x128xf32, #tpu.memory_space<vmem>>) attributes {dimension_semantics = [#tpu.dimension_semantics<parallel>], iteration_bounds = array<i64: 2>, scalar_prefetch = 1 : i64, scratch_operands = 0 : i64, tpu.core_type = #tpu.core_type<tc>, window_params = [{transform_indices = @transform_0, window_bounds = array<i64: 1, 16, 1>}, {transform_indices = @transform_1, window_bounds = array<i64: 1, 16, 1>}, {transform_indices = @transform_2, window_bounds = array<i64: 1, 8, 128>}, {transform_indices = @transform_3, window_bounds = array<i64: 1, 16, 128>}, {pipeline_mode = #tpu.pipeline_mode<synchronous>, transform_indices = @transform_4, window_bounds = array<i64: 128, 320>}, {pipeline_mode = #tpu.pipeline_mode<synchronous>, transform_indices = @transform_5, window_bounds = array<i64: 1, 320>}, {pipeline_mode = #tpu.pipeline_mode<synchronous>, transform_indices = @transform_6, window_bounds = array<i64: 128, 128>}, {pipeline_mode = #tpu.pipeline_mode<synchronous>, transform_indices = @transform_7, window_bounds = array<i64: 1, 128>}, {pipeline_mode = #tpu.pipeline_mode<synchronous>, transform_indices = @transform_8, window_bounds = array<i64: 1, 1>}, {pipeline_mode = #tpu.pipeline_mode<synchronous>, transform_indices = @transform_9, window_bounds = array<i64: 64, 32>}, {pipeline_mode = #tpu.pipeline_mode<synchronous>, transform_indices = @transform_10, window_bounds = array<i64: 64, 32>}, {pipeline_mode = #tpu.pipeline_mode<synchronous>, transform_indices = @transform_11, window_bounds = array<i64: 1, 32>}, {pipeline_mode = #tpu.pipeline_mode<synchronous>, transform_indices = @transform_12, window_bounds = array<i64: 1, 32>}, {pipeline_mode = #tpu.pipeline_mode<synchronous>, transform_indices = @transform_13, window_bounds = array<i64: 1, 32>}, {pipeline_mode = #tpu.pipeline_mode<synchronous>, transform_indices = @transform_14, window_bounds = array<i64: 32, 128>}, {pipeline_mode = #tpu.pipeline_mode<synchronous>, transform_indices = @transform_15, window_bounds = array<i64: 1, 128>}, {transform_indices = @transform_16, window_bounds = array<i64: 1, 8, 128>}]} {
    %0 = arith.index_cast %arg0 : i32 to index
    %c0 = arith.constant 0 : index
    %1 = memref.load %arg1[%0, %c0] : memref<2x2xi32, #tpu.memory_space<smem>>
    %c0_0 = arith.constant 0 : index
    %c0_1 = arith.constant 0 : index
    %c0_2 = arith.constant 0 : index
    %2 = vector.load %arg4[%c0_0, %c0_1, %c0_2] : memref<1x8x128xf32, #tpu.memory_space<vmem>>, vector<1x8x128xf32>
    %3 = vector.shape_cast %2 : vector<1x8x128xf32> to vector<8x128xf32>
    %c0_3 = arith.constant 0 : index
    %c0_4 = arith.constant 0 : index
    %c0_5 = arith.constant 0 : index
    %4 = vector.load %arg5[%c0_3, %c0_4, %c0_5] : memref<1x16x128xf32, #tpu.memory_space<vmem>>, vector<1x16x128xf32>
    %5 = vector.shape_cast %4 : vector<1x16x128xf32> to vector<16x128xf32>
    %c0_6 = arith.constant 0 : index
    %c0_7 = arith.constant 0 : index
    %c0_8 = arith.constant 0 : index
    %6 = vector.load %arg2[%c0_6, %c0_7, %c0_8] : memref<1x16x1xi32, #tpu.memory_space<vmem>>, vector<1x16x1xi32>
    %7 = vector.shape_cast %6 : vector<1x16x1xi32> to vector<16x1xi32>
    %c0_9 = arith.constant 0 : index
    %c0_10 = arith.constant 0 : index
    %c0_11 = arith.constant 0 : index
    %8 = vector.load %arg3[%c0_9, %c0_10, %c0_11] : memref<1x16x1xi32, #tpu.memory_space<vmem>>, vector<1x16x1xi32>
    %9 = vector.shape_cast %8 : vector<1x16x1xi32> to vector<16x1xi32>
    %c0_12 = arith.constant 0 : index
    %c0_13 = arith.constant 0 : index
    %10 = vector.load %arg6[%c0_12, %c0_13] : memref<128x320xf32, #tpu.memory_space<vmem>>, vector<128x320xf32>
    %cst = arith.constant dense<0.000000e+00> : vector<8x320xf32>
    %11 = tpu.matmul %3, %10, %cst {dimension_numbers = #tpu.dot_dimension_numbers<[1], [0], [0], [1], [0, 0, 1, 1], [], []>} : vector<8x128xf32>, vector<128x320xf32>, vector<8x320xf32> -> vector<8x320xf32>
    %c0_14 = arith.constant 0 : index
    %c0_15 = arith.constant 0 : index
    %12 = vector.load %arg7[%c0_14, %c0_15] : memref<1x320xf32, #tpu.memory_space<vmem>>, vector<1x320xf32>
    %13 = vector.broadcast %12 : vector<1x320xf32> to vector<8x320xf32>
    %14 = arith.addf %11, %13 : vector<8x320xf32>
    %15 = vector.extract_strided_slice %14 {offsets = [0, 0], sizes = [8, 128], strides = [1, 1]} : vector<8x320xf32> to vector<8x128xf32>
    %16 = vector.extract_strided_slice %14 {offsets = [0, 128], sizes = [8, 128], strides = [1, 1]} : vector<8x320xf32> to vector<8x128xf32>
    %17 = vector.extract_strided_slice %14 {offsets = [0, 256], sizes = [8, 64], strides = [1, 1]} : vector<8x320xf32> to vector<8x64xf32>
    %cst_16 = arith.constant 0.000000e+00 : f32
    %18 = vector.broadcast %cst_16 : f32 to vector<8x64xf32>
    %19 = arith.maximumf %17, %18 : vector<8x64xf32>
    %c0_17 = arith.constant 0 : index
    %c0_18 = arith.constant 0 : index
    %20 = vector.load %arg8[%c0_17, %c0_18] : memref<128x128xf32, #tpu.memory_space<vmem>>, vector<128x128xf32>
    %cst_19 = arith.constant dense<0.000000e+00> : vector<16x128xf32>
    %21 = tpu.matmul %5, %20, %cst_19 {dimension_numbers = #tpu.dot_dimension_numbers<[1], [0], [0], [1], [0, 0, 1, 1], [], []>} : vector<16x128xf32>, vector<128x128xf32>, vector<16x128xf32> -> vector<16x128xf32>
    %c0_20 = arith.constant 0 : index
    %c0_21 = arith.constant 0 : index
    %22 = vector.load %arg9[%c0_20, %c0_21] : memref<1x128xf32, #tpu.memory_space<vmem>>, vector<1x128xf32>
    %23 = vector.broadcast %22 : vector<1x128xf32> to vector<16x128xf32>
    %24 = arith.addf %21, %23 : vector<16x128xf32>
    %25 = tpu.iota {dimensions = array<i32: 1>} : vector<16x8xi32>
    %26 = vector.broadcast %7 : vector<16x1xi32> to vector<16x8xi32>
    %27 = arith.cmpi eq, %25, %26 : vector<16x8xi32>
    %28 = arith.extui %27 : vector<16x8xi1> to vector<16x8xi32>
    %29 = arith.sitofp %28 : vector<16x8xi32> to vector<16x8xf32>
    %30 = vector.broadcast %9 : vector<16x1xi32> to vector<16x8xi32>
    %31 = arith.cmpi eq, %25, %30 : vector<16x8xi32>
    %32 = arith.extui %31 : vector<16x8xi1> to vector<16x8xi32>
    %33 = arith.sitofp %32 : vector<16x8xi32> to vector<16x8xf32>
    %cst_22 = arith.constant dense<0.000000e+00> : vector<16x128xf32>
    %34 = tpu.matmul %29, %15, %cst_22 {dimension_numbers = #tpu.dot_dimension_numbers<[1], [0], [0], [1], [0, 0, 1, 1], [], []>} : vector<16x8xf32>, vector<8x128xf32>, vector<16x128xf32> -> vector<16x128xf32>
    %cst_23 = arith.constant dense<0.000000e+00> : vector<16x128xf32>
    %35 = tpu.matmul %33, %16, %cst_23 {dimension_numbers = #tpu.dot_dimension_numbers<[1], [0], [0], [1], [0, 0, 1, 1], [], []>} : vector<16x8xf32>, vector<8x128xf32>, vector<16x128xf32> -> vector<16x128xf32>
    %36 = arith.mulf %34, %35 : vector<16x128xf32>
    %37 = arith.mulf %36, %24 : vector<16x128xf32>
    %cst_24 = arith.constant dense<0.000000e+00> : vector<16xf32>
    %38 = vector.multi_reduction <add>, %37, %cst_24 [1] : vector<16x128xf32> to vector<16xf32>
    %39 = vector.shape_cast %38 : vector<16xf32> to vector<16x1xf32>
    %c0_25 = arith.constant 0 : index
    %c0_26 = arith.constant 0 : index
    %40 = vector.load %arg10[%c0_25, %c0_26] : memref<1x1xf32, #tpu.memory_space<vmem>>, vector<1x1xf32>
    %41 = vector.broadcast %40 : vector<1x1xf32> to vector<16x1xf32>
    %42 = arith.addf %39, %41 : vector<16x1xf32>
    %43 = vector.broadcast %42 : vector<16x1xf32> to vector<16x8xf32>
    %44 = arith.mulf %43, %33 : vector<16x8xf32>
    %cst_27 = arith.constant dense<0.000000e+00> : vector<8x8xf32>
    %45 = tpu.matmul %29, %44, %cst_27 {dimension_numbers = #tpu.dot_dimension_numbers<[0], [0], [1], [1], [0, 1, 1, 1], [], []>} : vector<16x8xf32>, vector<16x8xf32>, vector<8x8xf32> -> vector<8x8xf32>
    %46 = tpu.iota {dimensions = array<i32: 0>} : vector<8x8xi32>
    %47 = tpu.iota {dimensions = array<i32: 1>} : vector<8x8xi32>
    %48 = arith.cmpi ne, %46, %47 : vector<8x8xi32>
    %49 = vector.broadcast %1 : i32 to vector<8x8xi32>
    %50 = arith.cmpi slt, %46, %49 : vector<8x8xi32>
    %51 = arith.andi %48, %50 : vector<8x8xi1>
    %52 = vector.broadcast %1 : i32 to vector<8x8xi32>
    %53 = arith.cmpi slt, %47, %52 : vector<8x8xi32>
    %54 = arith.andi %51, %53 : vector<8x8xi1>
    %55 = arith.negf %45 : vector<8x8xf32>
    %56 = math.exp %55 : vector<8x8xf32>
    %cst_28 = arith.constant 1.000000e+00 : f32
    %57 = vector.broadcast %cst_28 : f32 to vector<8x8xf32>
    %58 = arith.addf %57, %56 : vector<8x8xf32>
    %59 = arith.divf %57, %58 : vector<8x8xf32>
    %cst_29 = arith.constant 0.000000e+00 : f32
    %60 = vector.broadcast %cst_29 : f32 to vector<8x8xf32>
    %61 = arith.select %54, %59, %60 : vector<8x8xi1>, vector<8x8xf32>
    %cst_30 = arith.constant dense<0.000000e+00> : vector<8xf32>
    %62 = vector.multi_reduction <add>, %61, %cst_30 [1] : vector<8x8xf32> to vector<8xf32>
    %63 = vector.shape_cast %62 : vector<8xf32> to vector<8x1xf32>
    %cst_31 = arith.constant 0.000000e+00 : f32
    %64 = vector.broadcast %cst_31 : f32 to vector<8x1xf32>
    %65 = arith.cmpf ogt, %63, %64 : vector<8x1xf32>
    %cst_32 = arith.constant 1.000000e+00 : f32
    %66 = vector.broadcast %cst_32 : f32 to vector<8x1xf32>
    %67 = arith.select %65, %63, %66 : vector<8x1xi1>, vector<8x1xf32>
    %68 = tpu.reciprocal %67 : vector<8x1xf32> -> vector<8x1xf32>
    %69 = vector.broadcast %68 : vector<8x1xf32> to vector<8x8xf32>
    %70 = arith.mulf %61, %69 : vector<8x8xf32>
    %c0_33 = arith.constant 0 : index
    %c0_34 = arith.constant 0 : index
    %71 = vector.load %arg11[%c0_33, %c0_34] : memref<64x32xf32, #tpu.memory_space<vmem>>, vector<64x32xf32>
    %cst_35 = arith.constant dense<0.000000e+00> : vector<8x32xf32>
    %72 = tpu.matmul %19, %71, %cst_35 {dimension_numbers = #tpu.dot_dimension_numbers<[1], [0], [0], [1], [0, 0, 1, 1], [], []>} : vector<8x64xf32>, vector<64x32xf32>, vector<8x32xf32> -> vector<8x32xf32>
    %c0_36 = arith.constant 0 : index
    %c0_37 = arith.constant 0 : index
    %73 = vector.load %arg12[%c0_36, %c0_37] : memref<64x32xf32, #tpu.memory_space<vmem>>, vector<64x32xf32>
    %cst_38 = arith.constant dense<0.000000e+00> : vector<8x32xf32>
    %74 = tpu.matmul %19, %73, %cst_38 {dimension_numbers = #tpu.dot_dimension_numbers<[1], [0], [0], [1], [0, 0, 1, 1], [], []>} : vector<8x64xf32>, vector<64x32xf32>, vector<8x32xf32> -> vector<8x32xf32>
    %cst_39 = arith.constant dense<0.000000e+00> : vector<8x32xf32>
    %75 = tpu.matmul %70, %72, %cst_39 {dimension_numbers = #tpu.dot_dimension_numbers<[1], [0], [0], [1], [0, 0, 1, 1], [], []>} : vector<8x8xf32>, vector<8x32xf32>, vector<8x32xf32> -> vector<8x32xf32>
    %cst_40 = arith.constant dense<0.000000e+00> : vector<8x32xf32>
    %76 = tpu.matmul %70, %74, %cst_40 {dimension_numbers = #tpu.dot_dimension_numbers<[0], [0], [1], [1], [0, 1, 1, 1], [], []>} : vector<8x8xf32>, vector<8x32xf32>, vector<8x32xf32> -> vector<8x32xf32>
    %77 = arith.addf %75, %76 : vector<8x32xf32>
    %c0_41 = arith.constant 0 : index
    %c0_42 = arith.constant 0 : index
    %78 = vector.load %arg13[%c0_41, %c0_42] : memref<1x32xf32, #tpu.memory_space<vmem>>, vector<1x32xf32>
    %79 = vector.broadcast %78 : vector<1x32xf32> to vector<8x32xf32>
    %80 = arith.addf %77, %79 : vector<8x32xf32>
    %cst_43 = arith.constant dense<0.000000e+00> : vector<8xf32>
    %81 = vector.multi_reduction <add>, %80, %cst_43 [1] : vector<8x32xf32> to vector<8xf32>
    %82 = vector.shape_cast %81 : vector<8xf32> to vector<8x1xf32>
    %cst_44 = arith.constant 3.200000e+01 : f32
    %83 = vector.broadcast %cst_44 : f32 to vector<8x1xf32>
    %84 = arith.divf %82, %83 : vector<8x1xf32>
    %85 = vector.broadcast %84 : vector<8x1xf32> to vector<8x32xf32>
    %86 = arith.subf %80, %85 : vector<8x32xf32>
    %87 = arith.mulf %86, %86 : vector<8x32xf32>
    %cst_45 = arith.constant dense<0.000000e+00> : vector<8xf32>
    %88 = vector.multi_reduction <add>, %87, %cst_45 [1] : vector<8x32xf32> to vector<8xf32>
    %89 = vector.shape_cast %88 : vector<8xf32> to vector<8x1xf32>
    %cst_46 = arith.constant 3.200000e+01 : f32
    %90 = vector.broadcast %cst_46 : f32 to vector<8x1xf32>
    %91 = arith.divf %89, %90 : vector<8x1xf32>
    %92 = vector.broadcast %84 : vector<8x1xf32> to vector<8x32xf32>
    %93 = arith.subf %80, %92 : vector<8x32xf32>
    %cst_47 = arith.constant 9.99999974E-6 : f32
    %94 = vector.broadcast %cst_47 : f32 to vector<8x1xf32>
    %95 = arith.addf %91, %94 : vector<8x1xf32>
    %96 = math.rsqrt %95 : vector<8x1xf32>
    %97 = vector.broadcast %96 : vector<8x1xf32> to vector<8x32xf32>
    %98 = arith.mulf %93, %97 : vector<8x32xf32>
    %c0_48 = arith.constant 0 : index
    %c0_49 = arith.constant 0 : index
    %99 = vector.load %arg14[%c0_48, %c0_49] : memref<1x32xf32, #tpu.memory_space<vmem>>, vector<1x32xf32>
    %100 = vector.broadcast %99 : vector<1x32xf32> to vector<8x32xf32>
    %101 = arith.mulf %98, %100 : vector<8x32xf32>
    %c0_50 = arith.constant 0 : index
    %c0_51 = arith.constant 0 : index
    %102 = vector.load %arg15[%c0_50, %c0_51] : memref<1x32xf32, #tpu.memory_space<vmem>>, vector<1x32xf32>
    %103 = vector.broadcast %102 : vector<1x32xf32> to vector<8x32xf32>
    %104 = arith.addf %101, %103 : vector<8x32xf32>
    %cst_52 = arith.constant 0.000000e+00 : f32
    %105 = vector.broadcast %cst_52 : f32 to vector<8x32xf32>
    %106 = arith.maximumf %104, %105 : vector<8x32xf32>
    %c0_53 = arith.constant 0 : index
    %c0_54 = arith.constant 0 : index
    %107 = vector.load %arg16[%c0_53, %c0_54] : memref<32x128xf32, #tpu.memory_space<vmem>>, vector<32x128xf32>
    %cst_55 = arith.constant dense<0.000000e+00> : vector<8x128xf32>
    %108 = tpu.matmul %106, %107, %cst_55 {dimension_numbers = #tpu.dot_dimension_numbers<[1], [0], [0], [1], [0, 0, 1, 1], [], []>} : vector<8x32xf32>, vector<32x128xf32>, vector<8x128xf32> -> vector<8x128xf32>
    %c0_56 = arith.constant 0 : index
    %c0_57 = arith.constant 0 : index
    %109 = vector.load %arg17[%c0_56, %c0_57] : memref<1x128xf32, #tpu.memory_space<vmem>>, vector<1x128xf32>
    %110 = vector.broadcast %109 : vector<1x128xf32> to vector<8x128xf32>
    %111 = arith.addf %108, %110 : vector<8x128xf32>
    %112 = arith.addf %3, %111 : vector<8x128xf32>
    %cst_58 = arith.constant 0.000000e+00 : f32
    %113 = vector.broadcast %cst_58 : f32 to vector<8x128xf32>
    %114 = arith.maximumf %112, %113 : vector<8x128xf32>
    %c0_59 = arith.constant 0 : index
    %c0_60 = arith.constant 0 : index
    %c0_61 = arith.constant 0 : index
    %115 = vector.load %arg18[%c0_59, %c0_60, %c0_61] : memref<1x8x128xf32, #tpu.memory_space<vmem>>, vector<1x8x128xf32>
    %116 = vector.shape_cast %115 : vector<1x8x128xf32> to vector<8x128xf32>
    %117 = vector.shape_cast %114 : vector<8x128xf32> to vector<1x8x128xf32>
    tpu.vector_store %arg18[%c0_59, %c0_60, %c0_61], %117 {strides = array<i32>} : memref<1x8x128xf32, #tpu.memory_space<vmem>>, vector<1x8x128xf32>,
    return
  }
  func.func @transform_0(%arg0: i32, %arg1: memref<2x2xi32, #tpu.memory_space<smem>>) -> (i32, i32, i32) {
    %c0_i32 = arith.constant 0 : i32
    %c0_i32_0 = arith.constant 0 : i32
    %c0_i32_1 = arith.constant 0 : i32
    return %arg0, %c0_i32, %c0_i32_0 : i32, i32, i32
  }
  func.func @transform_1(%arg0: i32, %arg1: memref<2x2xi32, #tpu.memory_space<smem>>) -> (i32, i32, i32) {
    %c0_i32 = arith.constant 0 : i32
    %c0_i32_0 = arith.constant 0 : i32
    %c0_i32_1 = arith.constant 0 : i32
    return %arg0, %c0_i32, %c0_i32_0 : i32, i32, i32
  }
  func.func @transform_2(%arg0: i32, %arg1: memref<2x2xi32, #tpu.memory_space<smem>>) -> (i32, i32, i32) {
    %c0_i32 = arith.constant 0 : i32
    %c0_i32_0 = arith.constant 0 : i32
    %c0_i32_1 = arith.constant 0 : i32
    return %arg0, %c0_i32, %c0_i32_0 : i32, i32, i32
  }
  func.func @transform_3(%arg0: i32, %arg1: memref<2x2xi32, #tpu.memory_space<smem>>) -> (i32, i32, i32) {
    %c0_i32 = arith.constant 0 : i32
    %c0_i32_0 = arith.constant 0 : i32
    %c0_i32_1 = arith.constant 0 : i32
    return %arg0, %c0_i32, %c0_i32_0 : i32, i32, i32
  }
  func.func @transform_4(%arg0: i32, %arg1: memref<2x2xi32, #tpu.memory_space<smem>>) -> (i32, i32) {
    %c0_i32 = arith.constant 0 : i32
    %c0_i32_0 = arith.constant 0 : i32
    %c0_i32_1 = arith.constant 0 : i32
    return %c0_i32, %c0_i32_0 : i32, i32
  }
  func.func @transform_5(%arg0: i32, %arg1: memref<2x2xi32, #tpu.memory_space<smem>>) -> (i32, i32) {
    %c0_i32 = arith.constant 0 : i32
    %c0_i32_0 = arith.constant 0 : i32
    %c0_i32_1 = arith.constant 0 : i32
    return %c0_i32, %c0_i32_0 : i32, i32
  }
  func.func @transform_6(%arg0: i32, %arg1: memref<2x2xi32, #tpu.memory_space<smem>>) -> (i32, i32) {
    %c0_i32 = arith.constant 0 : i32
    %c0_i32_0 = arith.constant 0 : i32
    %c0_i32_1 = arith.constant 0 : i32
    return %c0_i32, %c0_i32_0 : i32, i32
  }
  func.func @transform_7(%arg0: i32, %arg1: memref<2x2xi32, #tpu.memory_space<smem>>) -> (i32, i32) {
    %c0_i32 = arith.constant 0 : i32
    %c0_i32_0 = arith.constant 0 : i32
    %c0_i32_1 = arith.constant 0 : i32
    return %c0_i32, %c0_i32_0 : i32, i32
  }
  func.func @transform_8(%arg0: i32, %arg1: memref<2x2xi32, #tpu.memory_space<smem>>) -> (i32, i32) {
    %c0_i32 = arith.constant 0 : i32
    %c0_i32_0 = arith.constant 0 : i32
    %c0_i32_1 = arith.constant 0 : i32
    return %c0_i32, %c0_i32_0 : i32, i32
  }
  func.func @transform_9(%arg0: i32, %arg1: memref<2x2xi32, #tpu.memory_space<smem>>) -> (i32, i32) {
    %c0_i32 = arith.constant 0 : i32
    %c0_i32_0 = arith.constant 0 : i32
    %c0_i32_1 = arith.constant 0 : i32
    return %c0_i32, %c0_i32_0 : i32, i32
  }
  func.func @transform_10(%arg0: i32, %arg1: memref<2x2xi32, #tpu.memory_space<smem>>) -> (i32, i32) {
    %c0_i32 = arith.constant 0 : i32
    %c0_i32_0 = arith.constant 0 : i32
    %c0_i32_1 = arith.constant 0 : i32
    return %c0_i32, %c0_i32_0 : i32, i32
  }
  func.func @transform_11(%arg0: i32, %arg1: memref<2x2xi32, #tpu.memory_space<smem>>) -> (i32, i32) {
    %c0_i32 = arith.constant 0 : i32
    %c0_i32_0 = arith.constant 0 : i32
    %c0_i32_1 = arith.constant 0 : i32
    return %c0_i32, %c0_i32_0 : i32, i32
  }
  func.func @transform_12(%arg0: i32, %arg1: memref<2x2xi32, #tpu.memory_space<smem>>) -> (i32, i32) {
    %c0_i32 = arith.constant 0 : i32
    %c0_i32_0 = arith.constant 0 : i32
    %c0_i32_1 = arith.constant 0 : i32
    return %c0_i32, %c0_i32_0 : i32, i32
  }
  func.func @transform_13(%arg0: i32, %arg1: memref<2x2xi32, #tpu.memory_space<smem>>) -> (i32, i32) {
    %c0_i32 = arith.constant 0 : i32
    %c0_i32_0 = arith.constant 0 : i32
    %c0_i32_1 = arith.constant 0 : i32
    return %c0_i32, %c0_i32_0 : i32, i32
  }
  func.func @transform_14(%arg0: i32, %arg1: memref<2x2xi32, #tpu.memory_space<smem>>) -> (i32, i32) {
    %c0_i32 = arith.constant 0 : i32
    %c0_i32_0 = arith.constant 0 : i32
    %c0_i32_1 = arith.constant 0 : i32
    return %c0_i32, %c0_i32_0 : i32, i32
  }
  func.func @transform_15(%arg0: i32, %arg1: memref<2x2xi32, #tpu.memory_space<smem>>) -> (i32, i32) {
    %c0_i32 = arith.constant 0 : i32
    %c0_i32_0 = arith.constant 0 : i32
    %c0_i32_1 = arith.constant 0 : i32
    return %c0_i32, %c0_i32_0 : i32, i32
  }
  func.func @transform_16(%arg0: i32, %arg1: memref<2x2xi32, #tpu.memory_space<smem>>) -> (i32, i32, i32) {
    %c0_i32 = arith.constant 0 : i32
    %c0_i32_0 = arith.constant 0 : i32
    %c0_i32_1 = arith.constant 0 : i32
    return %arg0, %c0_i32, %c0_i32_0 : i32, i32, i32
  }
}

</mosaic_0001>

<bundles_post_ra>
// kernel: dmp_forward_batched.1
= control target key start
LH: loop header
LB: loop body
LE: loop exit
PB: predicated region body
PF: predicated region fallthrough
CT: control target
= control target key end

     0   :  { %s2783_s0 = inlined_call_operand.vmem [shape: s32[2,2], index: 0, kind: input, shape index: {}]   ;;  %s2784_s1 = inlined_call_operand.vmem [shape: s32[2,16,1], index: 1, kind: input, shape index: {}]   ;;  %s2785_s2 = inlined_call_operand.vmem [shape: s32[2,16,1], index: 2, kind: input, shape index: {}]   ;;  %s2786_s3 = inlined_call_operand.vmem [shape: f32[2,8,128], index: 3, kind: input, shape index: {}]   ;;  %s2787_s4 = inlined_call_operand.vmem [shape: f32[2,16,128], index: 4, kind: input, shape index: {}]   ;;  %s2788_s5 = inlined_call_operand.vmem [shape: f32[128,320], index: 5, kind: input, shape index: {}]   ;;  %s2789_s6 = inlined_call_operand.vmem [shape: f32[1,320], index: 6, kind: input, shape index: {}]   ;;  %s2790_s7 = inlined_call_operand.vmem [shape: f32[128,128], index: 7, kind: input, shape index: {}]   ;;  %s2791_s8 = inlined_call_operand.vmem [shape: f32[1,128], index: 8, kind: input, shape index: {}]   ;;  %s2792_s10 = inlined_call_operand.vmem [shape: f32[64,32], index: 10, kind: input, shape index: {}]   ;;  %s2793_s11 = inlined_call_operand.vmem [shape: f32[64,32], index: 11, kind: input, shape index: {}]   ;;  %s2794_s12 = inlined_call_operand.vmem [shape: f32[1,32], index: 12, kind: input, shape index: {}]   ;;  %s2795_s13 = inlined_call_operand.vmem [shape: f32[1,32], index: 13, kind: input, shape index: {}]   ;;  %s2796_s14 = inlined_call_operand.vmem [shape: f32[1,32], index: 14, kind: input, shape index: {}]   ;;  %s2797_s15 = inlined_call_operand.vmem [shape: f32[32,128], index: 15, kind: input, shape index: {}]   ;;  %s2798_s16 = inlined_call_operand.vmem [shape: f32[1,128], index: 16, kind: input, shape index: {}]   ;;  %s2799_s17 = inlined_call_operand.hbm [shape: f32[2,8,128], index: 17, kind: output, shape index: {}]   ;;  %s2800_s9 = inlined_call_operand.<no memory space> [shape: f32[1,1], index: 9, kind: input, shape index: {}]  }
   0x1   :  { %2808 = sst [smem:[#allocation15_spill]] %s2783_s0  ;;  %v26_v0 = vstv %s2800_s9 }
   0x2   :  { %2809 = sst [smem:[#allocation16_spill]] %s2784_s1  ;;  %27 = vst [vmem:[#allocation4] sm:$0x1] %v26_v0 }
   0x3   :  { %2810 = sst [smem:[#allocation17_spill]] %s2794_s12 }
   0x4   :  { %2811 = sst [smem:[#allocation18_spill]] %s2799_s17 }
   0x5   :  { %s2812_s26 = sld [smem:[#allocation15_spill]] }
   0xb   :  { %s22_s12 = sshll.u32 %s2812_s26, 4  ;;  %s23_s12 = int_to_ptr.vmem [resolvable:$true] %s22_s12 }
   0xc   :  { %s2131_s29 = scalar_lea.vmem %s23_s12, 32  ;;  %p2136_p1 = scmp.lt.s32.totalorder %s23_s12, %s23_s12 }
   0xd   :  { %p2132_p0 = scmp.ne.s32.totalorder %s23_s12, %s2131_s29  ;;  %p2137_p2 = scmp.lt.s32.totalorder %s2131_s29, %s2131_s29 }
   0xf   :  { %p2138_p3 = por %p2137_p2, %p2136_p1 }
  0x11   :  { %p2139_p4 = pnand %p2138_p3, %p2132_p0 }
  0x13   :  { %2142 = shalt.err (!%p2139_p4)  }
  0x14   :  { %s2207_s0 = smov [#allocation3]  }
  0x15   :  { %25 = dma.vmem_to_smem %s23_s12, 32, %s2207_s0, [#allocation2] }
  0x16   :  { %2185 = dma.done.wait [#allocation2], 32 }
  0x17   :  { %2186 = vsyncadd [#allocation2], 4294967264 }
  0x18   :  { %29 = sfence }
  0x19   :  { %30 = vsyncpa [#allocation6], 0 }
  0x1a   :  { %32 = vsyncpa [#allocation6 + $0x1], 0  ;;  %s2308_s30 = smov 0   ;;  %s2310_s18 = smov 0  }
  0x1b   :  { %s2312_s9 = smov 0   ;;  %s2314_s19 = smov 0  }
  0x1c LB: > { %2813 = sst [smem:[#allocation9_spill]] %s2193_s30  ;;  %s2329_s12 = sadd.s32 4294967295, %s2205_s19   ;;  %s2205_s19 = sphi %s2314_s19, %s2828_s19   ;;  %s2201_s9 = sphi %s2312_s9, %s2830_s9   ;;  %s2197_s18 = sphi %s2310_s18, %s2832_s18   ;;  %s2193_s30 = sphi %s2308_s30, %s2831_s30  }
  0x1d   : > { %2814 = sst [smem:[#allocation10_spill]] %s2201_s9  ;;  %s1820_s1 = sadd.s32 4294967294, %s2205_s19  }
  0x1e   : > { %2815 = sst [smem:[#allocation11_spill]] %s2205_s19  ;;  %s2333_s20 = sadd.s32 1, %s2205_s19  }
  0x1f   : > { %2816 = sst [smem:[#allocation12_spill]] %s2333_s20  ;;  %s401_s21 = sadd.s32 1, %s2201_s9 }
  0x20   : > { %s398_s22 = ssub.s32 %s2205_s19, %s2333_s20  ;;  %p411_p5 = scmp.ne.s32.totalorder %s2201_s9, %s2197_s18 }
  0x21   : > { %p399_p6 = scmp.eq.s32.totalorder %s398_s22, 0  ;;  %p412_p7 = scmp.eq.s32.totalorder %s2329_s12, 1 }
  0x22   : > { %p417_p8 = scmp.ne.s32.totalorder %s2197_s18, %s2193_s30  ;;  %p418_p9 = scmp.eq.s32.totalorder %s1820_s1, 1 }
  0x23   : > { %s2344_s23 = scalar_select %p399_p6, %s2201_s9, %s401_s21  }
  0x24   : > { %p2346_p10 = por %p412_p7, %p411_p5  ;;  %p2350_p11 = por %p418_p9, %p417_p8 }
  0x25   : > { %2817 = sst [smem:[#allocation13_spill]] %s2344_s23  ;;  %p1823_p12 = scmp.ge.s32.totalorder %s2205_s19, 1 }
  0x26   : > { %s2819_s25 = scalar_select %p2350_p11, 1, 0 }
  0x27   : > { %p503_p13 = scmp.lt.s32.totalorder %s2205_s19, 3 }
  0x28   : > { %2820 = sst [smem:[#allocation14_spill]] %s2819_s25 }
  0x29   : > { %p504_p0 = pnand %p1823_p12, %p503_p13 }
  0x2a   : > { %p567_p1 = scmp.lt.s32.totalorder (!%p504_p0), %s2329_s12, 1  ;;  %s2821_s20 = sld [smem:[#allocation16_spill]] (!%p504_p0) }
  0x2b   : > { %507 = sbr.rel (%p504_p0) target bundleno = 2005 (0x7d5), region = 84  ;;  %s2822_s29 = sld [smem:[#allocation17_spill]] (!%p504_p0) }
  0x2c   : > { %s2823_s19 = sld [smem:[#allocation18_spill]] (!%p504_p0)  ;;  %s2211_s28 = smov (!%p504_p0), [#allocation5]  }
  0x2d   : > { %s2147_s23 = sshll.u32 (!%p504_p0), %s2211_s28, 4  ;;  %s2148_s23 = int_to_ptr.vmem [resolvable:$false] %s2147_s23 }
  0x30   : > { %v641_v1 = vld [vmem:[%s2788_s5 + $0x170] sm:$0xff]  ;;  %v640_v2 = vld [vmem:[%s2788_s5 + $0x168] sm:$0xff]  ;;  %v638_v3 = vld [vmem:[%s2788_s5 + $0x158] sm:$0xff]  ;;  %v2208_v5 = vmov 0.0   ;;  %v2209_v7 = vmov 0   ;;  %s2377_s0 = scalar_select %p567_p1, %s2329_s12, 1 }
  0x31   : > { %660 = vmatprep.subr.mxu0 %v641_v1  ;;  %v637_v4 = vld [vmem:[%s2788_s5 + $0x150] sm:$0xff]  ;;  %724 = vmatprep.mubr.f32.mxu0 %v2208_v5  ;;  %v635_v6 = vld [vmem:[%s2788_s5 + $0x140] sm:$0xff]  ;;  %v634_v8 = vld [vmem:[%s2788_s5 + $0x138] sm:$0xff]  ;;  %vm2210_vm0 = vmmov 0   ;;  %vm926_vm1 = vcmask 64512   ;;  %vm1150_vm6 = vcmask 130048  }
  0x32   : > { %661 = vmatpush1.msra.mxu0 %v640_v2  ;;  %2121 = vset.pattern.permute.xlu0 %v2209_v7  ;;  %v632_v9 = vld [vmem:[%s2788_s5 + $0x128] sm:$0xff]  ;;  %v631_v10 = vld [vmem:[%s2788_s5 + $0x120] sm:$0xff]  ;;  %s2387_s27 = sshll.u32 %s2377_s0, 4  ;;  %v629_v11 = vld [vmem:[%s2788_s5 + $0x110] sm:$0xff]  ;;  %vm1254_vm7 = vcmask 523264   ;;  %vm1592_vm14 = vcmask 261120  }
  0x33   : > { %662 = vmatprep.subr.mxu0 %v638_v3  ;;  %2122 = vset.pattern.permute.xlu1 %v2209_v7  ;;  %v628_v12 = vld [vmem:[%s2788_s5 + $0x108] sm:$0xff]  ;;  %v626_v13 = vld [vmem:[%s2788_s5 + $0xf8] sm:$0xff]  ;;  %s571_s25 = scalar_lea.vmem %s2821_s20, %s2387_s27  ;;  %s576_s17 = scalar_lea.vmem %s2785_s2, %s2387_s27  ;;  %v625_v14 = vld [vmem:[%s2788_s5 + $0xf0] sm:$0xff] }
  0x34   : > { %663 = vmatpush1.msra.mxu0 %v637_v4  ;;  %1932 = vmatprep.subr.mxu1 %v2208_v5  ;;  %v623_v15 = vld [vmem:[%s2788_s5 + $0xe0] sm:$0xff]  ;;  %v622_v16 = vld [vmem:[%s2788_s5 + $0xd8] sm:$0xff]  ;;  %v620_v19 = vld [vmem:[%s2788_s5 + $0xc8] sm:$0xff] }
  0x35   : > { %664 = vmatprep.subr.mxu0 %v635_v6  ;;  %v591_v17 = vld [vmem:[%s571_s25] sm:$0xff]  ;;  %v642_v20 = vld [vmem:[%s2788_s5 + $0x178] sm:$0xff]  ;;  %v592_v22 = vld [vmem:[%s571_s25 + $0x8] sm:$0xff]  ;;  %s1829_s25 = sshll.u32 %s2377_s0, 3  ;;  %1964 = vmatprep.mubr.msk.f32.mxu1 %vm2210_vm0, %v2208_v5  ;;  %s564_s0 = sand.u32 1, %s2197_s18  }
  0x36   : > { %665 = vmatpush1.msra.mxu0 %v634_v8  ;;  %v593_v18 = vld [vmem:[%s576_s17] sm:$0xff]  ;;  %903 = vperm.xlu0 %2121, %v591_v17   ;;  %v617_v23 = vld [vmem:[%s2788_s5 + $0xb0] sm:$0xff]  ;;  %v594_v24 = vld [vmem:[%s576_s17 + $0x8] sm:$0xff]  ;;  %s580_s9 = scalar_lea.vmem %s2786_s3, %s1829_s25  ;;  %s1832_s25 = sshll.u32 %s2329_s12, 7 }
  0x37   : > { %666 = vmatprep.subr.mxu0 %v632_v9  ;;  %v619_v21 = vld [vmem:[%s2788_s5 + $0xc0] sm:$0xff]  ;;  %915 = vperm.xlu1 %2122, %v593_v18   ;;  %v616_v25 = vld [vmem:[%s2788_s5 + $0xa8] sm:$0xff]  ;;  %v614_v27 = vld [vmem:[%s2788_s5 + $0x98] sm:$0xff]  ;;  %s587_s26 = sld [smem:[#allocation3 + %s1832_s25]]  ;;  %s2824_s17 = smov %s2823_s19 }
  0x38   : > { %667 = vmatpush1.msra.mxu0 %v631_v10  ;;  %1933 = vmatpush3.msra.mxu1 %v642_v20  ;;  %v639_v26 = vld [vmem:[%s2788_s5 + $0x160] sm:$0xff]  ;;  %v613_v28 = vld [vmem:[%s2788_s5 + $0x90] sm:$0xff]  ;;  %v636_v29 = vld [vmem:[%s2788_s5 + $0x148] sm:$0xff]  ;;  %s1723_s20 = scalar_lea.hbm %s2823_s19, %s1832_s25  ;;  %s1712_s22 = scalar_lea.sflag [#allocation6], %s564_s0 }
  0x39   : > { %668 = vmatprep.subr.mxu0 %v629_v11  ;;  %1934 = vmatprep.subr.mxu1 %v2208_v5  ;;  %v611_v30 = vld [vmem:[%s2788_s5 + $0x80] sm:$0xff]  ;;  %v610_v31 = vld [vmem:[%s2788_s5 + $0x78] sm:$0xff]  ;;  %v633_v32 = vld [vmem:[%s2788_s5 + $0x130] sm:$0xff]  ;;  %v645_v11 = vlaneseq }
  0x3a   : > { %669 = vmatpush1.msra.mxu0 %v628_v12  ;;  %906 = vperm.xlu0 %2121, %v592_v22   ;;  %v608_v33 = vld [vmem:[%s2788_s5 + $0x68] sm:$0xff]  ;;  %v607_v34 = vld [vmem:[%s2788_s5 + $0x60] sm:$0xff]  ;;  %v630_v35 = vld [vmem:[%s2788_s5 + $0x118] sm:$0xff] }
  0x3b   : > { %670 = vmatprep.subr.mxu0 %v626_v13  ;;  %918 = vperm.xlu1 %2122, %v594_v24   ;;  %v605_v36 = vld [vmem:[%s2788_s5 + $0x50] sm:$0xff]  ;;  %v604_v37 = vld [vmem:[%s2788_s5 + $0x48] sm:$0xff]  ;;  %v627_v38 = vld [vmem:[%s2788_s5 + $0x100] sm:$0xff]  ;;  %v2597_v12 = vand.u32 127, %v645_v11 }
  0x3c   : > { %671 = vmatpush1.msra.mxu0 %v625_v14  ;;  %1935 = vmatpush3.msra.mxu1 %v639_v26  ;;  %v602_v39 = vld [vmem:[%s2788_s5 + $0x38] sm:$0xff]  ;;  %v601_v40 = vld [vmem:[%s2788_s5 + $0x30] sm:$0xff]  ;;  %v624_v41 = vld [vmem:[%s2788_s5 + $0xe8] sm:$0xff] }
  0x3d   : > { %672 = vmatprep.subr.mxu0 %v623_v15  ;;  %1936 = vmatprep.subr.mxu1 %v2208_v5  ;;  %v599_v42 = vld [vmem:[%s2788_s5 + $0x20] sm:$0xff]  ;;  %v598_v43 = vld [vmem:[%s2788_s5 + $0x18] sm:$0xff]  ;;  %v621_v44 = vld [vmem:[%s2788_s5 + $0xd0] sm:$0xff]  ;;  %v2602_v15 = vshrl.u32 %v645_v11, 7 }
  0x3e   : > { %673 = vmatpush1.msra.mxu0 %v622_v16  ;;  %1937 = vmatpush3.msra.mxu1 %v636_v29  ;;  %v596_v45 = vld [vmem:[%s2788_s5 + $0x8] sm:$0xff]  ;;  %v595_v46 = vld [vmem:[%s2788_s5] sm:$0xff]  ;;  %v618_v47 = vld [vmem:[%s2788_s5 + $0xb8] sm:$0xff] }
  0x3f   : > { %674 = vmatprep.subr.mxu0 %v620_v19  ;;  %1938 = vmatprep.subr.mxu1 %v2208_v5  ;;  %v2507_v48 = vld [vmem:[%s580_s9] sm:$0xff]  ;;  %v817_v49 = vld [vmem:[%s2790_s7 + $0x78] sm:$0xff]  ;;  %v816_v50 = vld [vmem:[%s2790_s7 + $0x70] sm:$0xff]  ;;  %s585_s9 = scalar_lea.vmem %s2787_s4, %s2387_s27  ;;  %v647_v16 = vsub.s32 0, %v2602_v15  ;;  %v651_v18 = vsub.s32 1, %v2602_v15  ;;  %vm1226_vm8 = vcmp.ne.s32.totalorder %v2602_v15, %v2597_v12 }
  0x40   : > { %675 = vmatpush1.msra.mxu0 %v619_v21  ;;  %1939 = vmatpush3.msra.mxu1 %v633_v32  ;;  %v615_v51 = vld [vmem:[%s2788_s5 + $0xa0] sm:$0xff]  ;;  %v815_v52 = vld [vmem:[%s2790_s7 + $0x68] sm:$0xff]  ;;  %v609_v55 = vld [vmem:[%s2788_s5 + $0x70] sm:$0xff] }
  0x41   : > { %676 = vmatprep.subr.mxu0 %v617_v23  ;;  %1940 = vmatprep.subr.mxu1 %v2208_v5  ;;  %v612_v53 = vld [vmem:[%s2788_s5 + $0x88] sm:$0xff]  ;;  %v814_v54 = vld [vmem:[%s2790_s7 + $0x60] sm:$0xff]  ;;  %v813_v56 = vld [vmem:[%s2790_s7 + $0x58] sm:$0xff] }
  0x42   : > { %677 = vmatpush1.msra.mxu0 %v616_v25  ;;  %1941 = vmatpush3.msra.mxu1 %v630_v35  ;;  %v606_v57 = vld [vmem:[%s2788_s5 + $0x58] sm:$0xff]  ;;  %v812_v58 = vld [vmem:[%s2790_s7 + $0x50] sm:$0xff]  ;;  %v603_v59 = vld [vmem:[%s2788_s5 + $0x40] sm:$0xff] }
  0x43   : > { %678 = vmatprep.subr.mxu0 %v614_v27  ;;  %1942 = vmatprep.subr.mxu1 %v2208_v5  ;;  %v811_v60 = vld [vmem:[%s2790_s7 + $0x48] sm:$0xff]  ;;  %v810_v62 = vld [vmem:[%s2790_s7 + $0x40] sm:$0xff]  ;;  %v809_v63 = vld [vmem:[%s2790_s7 + $0x38] sm:$0xff] }
  0x44   : > { %679 = vmatpush1.msra.mxu0 %v613_v28  ;;  %1943 = vmatpush3.msra.mxu1 %v627_v38  ;;  %v600_v61 = vld [vmem:[%s2788_s5 + $0x28] sm:$0xff]  ;;  %v808_v0 = vld [vmem:[%s2790_s7 + $0x30] sm:$0xff]  ;;  %v806_v2 = vld [vmem:[%s2790_s7 + $0x20] sm:$0xff] }
  0x45   : > { %680 = vmatprep.subr.mxu0 %v611_v30  ;;  %1944 = vmatprep.subr.mxu1 %v2208_v5  ;;  %v807_v1 = vld [vmem:[%s2790_s7 + $0x28] sm:$0xff]  ;;  %v597_v3 = vld [vmem:[%s2788_s5 + $0x10] sm:$0xff]  ;;  %v805_v4 = vld [vmem:[%s2790_s7 + $0x18] sm:$0xff] }
  0x46   : > { %681 = vmatpush1.msra.mxu0 %v610_v31  ;;  %1945 = vmatpush3.msra.mxu1 %v624_v41  ;;  %v804_v6 = vld [vmem:[%s2790_s7 + $0x10] sm:$0xff]  ;;  %v803_v7 = vld [vmem:[%s2790_s7 + $0x8] sm:$0xff]  ;;  %v802_v8 = vld [vmem:[%s2790_s7] sm:$0xff] }
  0x47   : > { %682 = vmatprep.subr.mxu0 %v608_v33  ;;  %1946 = vmatprep.subr.mxu1 %v2208_v5  ;;  %v589_v9 = vld [vmem:[%s585_s9] sm:$0xff]  ;;  %v590_v10 = vld [vmem:[%s585_s9 + $0x8] sm:$0xff]  ;;  %v1330_v11 = vld [vmem:[%s2793_s11 + $0x10] sm:$0xff] }
  0x48   : > { %683 = vmatpush1.msra.mxu0 %v607_v34  ;;  %1947 = vmatpush3.msra.mxu1 %v621_v44  ;;  %v2608_v17 = vld [vmem:[%s2789_s6] sm:$0x7] }
  0x49   : > { %684 = vmatprep.subr.mxu0 %v605_v36  ;;  %1948 = vmatprep.subr.mxu1 %v2208_v5  ;;  %v648_v20 = vrot.slane %v2608_v17, %v647_v16  ;;  %v652_v22 = vrot.slane %v2608_v17, %v651_v18  ;;  %v1833_v35 = vld [vmem:[%s2791_s8] ss:$0 sm:$0xff] }
  0x4a   : > { %685 = vmatpush1.msra.mxu0 %v604_v37  ;;  %1949 = vmatpush3.msra.mxu1 %v618_v47 }
  0x4b   : > { %686 = vmatprep.subr.mxu0 %v602_v39  ;;  %1950 = vmatprep.subr.mxu1 %v2208_v5 }
  0x4c   : > { %687 = vmatpush1.msra.mxu0 %v601_v40  ;;  %1951 = vmatpush3.msra.mxu1 %v615_v51 }
  0x4d   : > { %688 = vmatprep.subr.mxu0 %v599_v42  ;;  %1952 = vmatprep.subr.mxu1 %v2208_v5 }
  0x4e   : > { %689 = vmatpush1.msra.mxu0 %v598_v43  ;;  %1953 = vmatpush3.msra.mxu1 %v612_v53 }
  0x4f   : > { %690 = vmatprep.subr.mxu0 %v596_v45  ;;  %1954 = vmatprep.subr.mxu1 %v2208_v5 }
  0x50   : > { %691 = vmatpush1.msra.mxu0 %v595_v46  ;;  %1955 = vmatpush3.msra.mxu1 %v609_v55  ;;  %v1842_v46 = vld [vmem:[#allocation4] ss:$0 sm:$0xff] }
  0x51   : > { %725 = vmatmul.mubr.f32.vlgmr.msra.gmra.mxu0 %v2507_v48  ;;  %1967 = vmatprep.subr.mxu0 %v817_v49 }
  0x52   : > { %1968 = vmatpush3.msra.mxu0 %v817_v49  ;;  %1956 = vmatprep.subr.mxu1 %v2208_v5 }
  0x53   : > { %1969 = vmatprep.subr.mxu0 %v816_v50  ;;  %1957 = vmatpush3.msra.mxu1 %v606_v57 }
  0x54   : > { %1970 = vmatpush3.msra.mxu0 %v816_v50  ;;  %1958 = vmatprep.subr.mxu1 %v2208_v5 }
  0x55   : > { %1971 = vmatprep.subr.mxu0 %v815_v52  ;;  %1959 = vmatpush3.msra.mxu1 %v603_v59  ;;  %v655_v59 = vsub.s32 2, %v2602_v15 }
  0x56   : > { %1972 = vmatpush3.msra.mxu0 %v815_v52  ;;  %1960 = vmatprep.subr.mxu1 %v2208_v5 }
  0x57   : > { %1973 = vmatprep.subr.mxu0 %v814_v54  ;;  %1961 = vmatpush3.msra.mxu1 %v600_v61  ;;  %v1250_v61 = vld [vmem:[%s2792_s10 + $0x20] sm:$0xff] }
  0x58   : > { %1974 = vmatpush3.msra.mxu0 %v814_v54  ;;  %1962 = vmatprep.subr.mxu1 %v2208_v5 }
  0x59   : > { %1975 = vmatprep.subr.mxu0 %v813_v56  ;;  %1963 = vmatpush3.msra.mxu1 %v597_v3  ;;  %v1246_v3 = vld [vmem:[%s2792_s10] sm:$0xff] }
  0x5a   : > { %1976 = vmatpush3.msra.mxu0 %v813_v56  ;;  %1965 = vmatmul.mubr.f32.vlgmr.msra.gmra.mxu1 %v2507_v48  ;;  %v1253_v56 = vld [vmem:[%s2792_s10 + $0x38] sm:$0xff] }
  0x5b   : > { %1977 = vmatprep.subr.mxu0 %v812_v58  ;;  %1999 = vmatprep.mubr.f32.mxu0 %v589_v9  ;;  %v1332_v9 = vld [vmem:[%s2793_s11 + $0x20] sm:$0xff] }
  0x5c   : > { %1978 = vmatpush3.msra.mxu0 %v812_v58  ;;  %v1252_v58 = vld [vmem:[%s2792_s10 + $0x30] sm:$0xff] }
  0x5d   : > { %1979 = vmatprep.subr.mxu0 %v811_v60 }
  0x5e   : > { %1980 = vmatpush3.msra.mxu0 %v811_v60  ;;  %v1251_v60 = vld [vmem:[%s2792_s10 + $0x28] sm:$0xff] }
  0x5f   : > { %1981 = vmatprep.subr.mxu0 %v810_v62 }
  0x60   : > { %1982 = vmatpush3.msra.mxu0 %v810_v62  ;;  %v656_v62 = vrot.slane %v2608_v17, %v655_v59 }
  0x61   : > { %1983 = vmatprep.subr.mxu0 %v809_v63 }
  0x62   : > { %1984 = vmatpush3.msra.mxu0 %v809_v63  ;;  %v1249_v63 = vld [vmem:[%s2792_s10 + $0x18] sm:$0xff] }
  0x63   : > { %1985 = vmatprep.subr.mxu0 %v808_v0 }
  0x64   : > { %1986 = vmatpush3.msra.mxu0 %v808_v0  ;;  %v1248_v0 = vld [vmem:[%s2792_s10 + $0x10] sm:$0xff] }
  0x65   : > { %1987 = vmatprep.subr.mxu0 %v807_v1 }
  0x66   : > { %1988 = vmatpush3.msra.mxu0 %v807_v1 }
  0x67   : > { %1989 = vmatprep.subr.mxu0 %v806_v2 }
  0x68   : > { %1990 = vmatpush3.msra.mxu0 %v806_v2  ;;  %v1247_v2 = vld [vmem:[%s2792_s10 + $0x8] sm:$0xff] }
  0x69   : > { %1991 = vmatprep.subr.mxu0 %v805_v4 }
  0x6a   : > { %1992 = vmatpush3.msra.mxu0 %v805_v4 }
  0x6b   : > { %1993 = vmatprep.subr.mxu0 %v804_v6 }
  0x6c   : > { %1994 = vmatpush3.msra.mxu0 %v804_v6  ;;  %v1335_v6 = vld [vmem:[%s2793_s11 + $0x38] sm:$0xff] }
  0x6d   : > { %1995 = vmatprep.subr.mxu0 %v803_v7 }
  0x6e   : > { %1996 = vmatpush3.msra.mxu0 %v803_v7  ;;  %v1334_v7 = vld [vmem:[%s2793_s11 + $0x30] sm:$0xff] }
  0x6f   : > { %1997 = vmatprep.subr.mxu0 %v802_v8 }
  0x70   : > { %1998 = vmatpush3.msra.mxu0 %v802_v8  ;;  %v1333_v8 = vld [vmem:[%s2793_s11 + $0x28] sm:$0xff] }
  0x71   : > { %2000 = vmatmul.mubr.f32.vlgmr.msra.gmra.mxu0 %v590_v10  ;;  %2057 = vmatprep.subr.mxu0 %v2208_v5  ;;  %v1331_v10 = vld [vmem:[%s2793_s11 + $0x18] sm:$0xff] }
  0x72   : > { %2059 = vmatprep.mubr.msk.f32.mxu0 %vm2210_vm0, %v2208_v5 }
  0xb1   : > { %v904_v13 = vpop.permute.xlu0 %903 }
  0xb2   : > { %vm908_vm2 = vcmp.eq.s32.totalorder %v2597_v12, %v904_v13  ;;  %v916_v19 = vpop.permute.xlu1 %915  ;;  %v1329_v13 = vld [vmem:[%s2793_s11 + $0x8] sm:$0xff] }
  0xb3   : > { %v1834_v14 = vsel %vm908_vm2, 1.0, %v2208_v5  ;;  %vm920_vm3 = vcmp.eq.s32.totalorder %v2597_v12, %v916_v19 }
  0xb4   : > { %2004 = vmatprep.mubr.msk.f32.mxu1 %vm926_vm1, %v1834_v14  ;;  %v1836_v27 = vsel %vm920_vm3, 1.0, %v2208_v5 }
  0xb5   : > { %v907_v21 = vpop.permute.xlu0 %906 }
  0xb6   : > { %vm909_vm4 = vcmp.eq.s32.totalorder %v2597_v12, %v907_v21  ;;  %v919_v26 = vpop.permute.xlu1 %918 }
  0xb7   : > { %v1835_v29 = vsel %vm909_vm4, 1.0, %v2208_v5  ;;  %vm921_vm5 = vcmp.eq.s32.totalorder %v2597_v12, %v919_v26 }
  0xb8   : > { %v1837_v30 = vsel %vm921_vm5, 1.0, %v2208_v5 }
 0x111   : > { %v726_v23 = vpop.f32.mrf.mxu0 }
 0x112   : > { %v727_v24 = vadd.f32 %v726_v23, %v648_v20  ;;  %v1227_v23 = vstv %s587_s26 }
 0x113   : > { %v728_v25 = vpop.f32.mrf.mxu0  ;;  %vm1228_vm9 = vcmp.lt.s32.totalorder %v2602_v15, %v1227_v23  ;;  %vm1230_vm11 = vcmp.lt.s32.totalorder %v2597_v12, %v1227_v23 }
 0x114   : > { %v729_v28 = vadd.f32 %v728_v25, %v652_v22  ;;  %2002 = vmatprep.subr.mxu1 %v727_v24  ;;  %vm1229_vm10 = vmand %vm1226_vm8, %vm1228_vm9 }
 0x115   : > { %2003 = vmatpush3.msra.mxu1 %v727_v24  ;;  %vm1231_vm12 = vmand %vm1229_vm10, %vm1230_vm11 }
 0x116   : > { %2007 = vmatprep.subr.mxu1 %v729_v28  ;;  %2005 = vmatmul.mubr.msk.f32.vlgmr.msra.gmra.mxu1 %vm926_vm1, %v1835_v29 }
 0x117   : > { %2008 = vmatpush3.msra.mxu1 %v729_v28  ;;  %2009 = vmatprep.mubr.msk.f32.mxu1 %vm926_vm1, %v1836_v27 }
 0x118   : > { %2012 = vmatprep.subr.mxu1 %v2208_v5 }
 0x11a   : > { %2010 = vmatmul.mubr.msk.f32.vlgmr.msra.gmra.mxu1 %vm926_vm1, %v1837_v30  ;;  %v797_v31 = vpop.f32.mrf.mxu1 }
 0x11b   : > { %2016 = vmatprep.mubr.msk.f32.mxu1 %vm2210_vm0, %v2208_v5  ;;  %v798_v1 = vadd.f32 %v797_v31, %v656_v62 }
 0x11c   : > { %v1966_v32 = vpop.f32.mrf.mxu1 }
 0x11d   : > { %v801_v4 = vmax.f32 %v798_v1, 0.0 }
 0x131   : > { %v2001_v34 = vpop.f32.mrf.mxu0 }
 0x132   : > { %v897_v37 = vadd.f32 %v2001_v34, %v1833_v35 }
 0x133   : > { %v891_v39 = vpop.f32.mrf.mxu0 }
 0x134   : > { %v892_v42 = vadd.f32 %v1833_v35, %v891_v39  ;;  %v1849_v35 = vld [vmem:[%s2822_s29] ss:$0 sm:$0xff]  ;;  %s1824_s29 = sshll.u32 %s564_s0, 3 }
 0x135   : > { %s566_s21 = scalar_lea.vmem [#allocation5], %s1824_s29  ;;  %s2149_s29 = scalar_lea.vmem %s2148_s23, 256 }
 0x136   : > { %s1725_s9 = sshll.u32 %s566_s21, 4  ;;  %s1726_s9 = int_to_ptr.vmem [resolvable:$true] %s1725_s9 }
 0x137   : > { %s2143_s26 = scalar_lea.vmem %s1726_s9, 128  ;;  %p2150_p5 = scmp.lt.s32.totalorder %s1726_s9, %s2148_s23 }
 0x138   : > { %p2144_p2 = scmp.ne.s32.totalorder %s1726_s9, %s2143_s26  ;;  %p2151_p6 = scmp.lt.s32.totalorder %s2149_s29, %s2143_s26 }
 0x13a   : > { %p2145_p3 = pnand %p2144_p2, %p2346_p10  ;;  %p2152_p7 = por %p2151_p6, %p2150_p5 }
 0x13c   : > { %p2146_p4 = pneg %p2145_p3 }
 0x13e   : > { %p2153_p8 = pnand %p2152_p7, %p2146_p4 }
 0x1d6   : > { %v2006_v33 = vpop.f32.mrf.mxu1 }
 0x1d8   : > { %v999_v36 = vpop.f32.mrf.mxu1 }
 0x1da   : > { %v2011_v38 = vpop.f32.mrf.mxu1 }
 0x1db   : > { %v1090_v40 = vmul.f32 %v2011_v38, %v2006_v33 }
 0x1dc   : > { %v1080_v41 = vpop.f32.mrf.mxu1 }
 0x1dd   : > { %v1089_v43 = vmul.f32 %v1080_v41, %v999_v36  ;;  %v1092_v44 = vmul.f32 %v1090_v40, %v897_v37 }
 0x1df   : > { %1095 = vadd.xlane.f32.xlu0 %v1092_v44  ;;  %v1091_v45 = vmul.f32 %v1089_v43, %v892_v42 }
 0x1e1   : > { %1093 = vadd.xlane.f32.xlu1 %v1091_v45  ;;  %v1627_v45 = vld [vmem:[%s2797_s15 + $0x18] sm:$0xff] }
 0x268   : > { %v1096_v47 = vpop.xlane.xlu0 %1095 }
 0x269   : > { %v1105_v49 = vadd.f32 %v1842_v46, %v1096_v47  ;;  %v1625_v47 = vld [vmem:[%s2797_s15 + $0x8] sm:$0xff] }
 0x26a   : > { %v1094_v50 = vpop.xlane.xlu1 %1093 }
 0x26b   : > { %v1104_v51 = vadd.f32 %v1842_v46, %v1094_v50  ;;  %1113 = vperm.xlu0 %2121, %v1105_v49   ;;  %v1626_v46 = vld [vmem:[%s2797_s15 + $0x10] sm:$0xff]  ;;  %v1624_v49 = vld [vmem:[%s2797_s15] sm:$0xff] }
 0x26d   : > { %1108 = vperm.xlu1 %2122, %v1104_v51  }
 0x289   : > { %1118 = vxpose.xlu0.b32.start [1/2] (short) (narrow) %v1834_v14, 8  ;;  %v1328_v14 = vld [vmem:[%s2793_s11] sm:$0xff] }
 0x28d   : > { %1119 = vxpose.xlu0.b32.end [2/2] (short) (narrow) %v1835_v29, 8 }
 0x2e6   : > { %v1114_v52 = vpop.permute.xlu0 %1113 }
 0x2e7   : > { %v1117_v53 = vmul.f32 %v1837_v30, %v1114_v52 }
 0x2e8   : > { %v1109_v54 = vpop.permute.xlu1 %1108 }
 0x2e9   : > { %v1116_v55 = vmul.f32 %v1836_v27, %v1109_v54  ;;  %2013 = vmatpush3.msra.mxu1 %v1117_v53  ;;  %v1850_v54 = vld [vmem:[%s2795_s13] ss:$0 sm:$0xff] }
 0x2ea   : > { %2014 = vmatprep.subr.mxu1 %v2208_v5 }
 0x2eb   : > { %2015 = vmatpush3.msra.mxu1 %v1116_v55 }
 0x2ec   : > { %2019 = vmatprep.subr.mxu1 %v2208_v5 }
 0x305   : > { %v1134_v57 = vpop.trf.xlu0 }
 0x306   : > { %2017 = vmatmul.mubr.msk.f32.vlgmr.msra.gmra.mxu1 %vm1150_vm6, %v1134_v57 }
 0x307   : > { %2020 = vmatpush3.msra.mxu1 %v1253_v56  ;;  %2035 = vmatprep.mubr.msk.f32.mxu1 %vm2210_vm0, %v2208_v5  ;;  %v1851_v56 = vld [vmem:[%s2796_s14] ss:$0 sm:$0xff] }
 0x308   : > { %2021 = vmatprep.subr.mxu1 %v2208_v5 }
 0x309   : > { %2022 = vmatpush3.msra.mxu1 %v1252_v58 }
 0x30a   : > { %2023 = vmatprep.subr.mxu1 %v2208_v5 }
 0x30b   : > { %2024 = vmatpush3.msra.mxu1 %v1251_v60 }
 0x30c   : > { %2025 = vmatprep.subr.mxu1 %v2208_v5 }
 0x30d   : > { %2026 = vmatpush3.msra.mxu1 %v1250_v61 }
 0x30e   : > { %2027 = vmatprep.subr.mxu1 %v2208_v5 }
 0x30f   : > { %2028 = vmatpush3.msra.mxu1 %v1249_v63 }
 0x310   : > { %2029 = vmatprep.subr.mxu1 %v2208_v5 }
 0x311   : > { %2030 = vmatpush3.msra.mxu1 %v1248_v0 }
 0x312   : > { %2031 = vmatprep.subr.mxu1 %v2208_v5 }
 0x313   : > { %2032 = vmatpush3.msra.mxu1 %v1247_v2 }
 0x314   : > { %2033 = vmatprep.subr.mxu1 %v2208_v5 }
 0x315   : > { %2034 = vmatpush3.msra.mxu1 %v1246_v3 }
 0x316   : > { %2036 = vmatmul.mubr.msk.f32.vlgmr.msra.gmra.mxu1 %vm1254_vm7, %v801_v4  ;;  %2038 = vmatprep.subr.mxu1 %v2208_v5 }
 0x317   : > { %2039 = vmatpush3.msra.mxu1 %v1335_v6  ;;  %2054 = vmatprep.mubr.msk.f32.mxu1 %vm2210_vm0, %v2208_v5 }
 0x318   : > { %2040 = vmatprep.subr.mxu1 %v2208_v5 }
 0x319   : > { %2041 = vmatpush3.msra.mxu1 %v1334_v7 }
 0x31a   : > { %2042 = vmatprep.subr.mxu1 %v2208_v5 }
 0x31b   : > { %2043 = vmatpush3.msra.mxu1 %v1333_v8 }
 0x31c   : > { %2044 = vmatprep.subr.mxu1 %v2208_v5 }
 0x31d   : > { %2045 = vmatpush3.msra.mxu1 %v1332_v9 }
 0x31e   : > { %2046 = vmatprep.subr.mxu1 %v2208_v5 }
 0x31f   : > { %2047 = vmatpush3.msra.mxu1 %v1331_v10 }
 0x320   : > { %2048 = vmatprep.subr.mxu1 %v2208_v5 }
 0x321   : > { %2049 = vmatpush3.msra.mxu1 %v1330_v11 }
 0x322   : > { %2050 = vmatprep.subr.mxu1 %v2208_v5 }
 0x323   : > { %2051 = vmatpush3.msra.mxu1 %v1329_v13 }
 0x324   : > { %2052 = vmatprep.subr.mxu1 %v2208_v5 }
 0x325   : > { %2053 = vmatpush3.msra.mxu1 %v1328_v14 }
 0x326   : > { %2055 = vmatmul.mubr.msk.f32.vlgmr.msra.gmra.mxu1 %vm1254_vm7, %v801_v4 }
 0x3c6   : > { %v1220_v16 = vpop.f32.mrf.mxu1 }
 0x3c7   : > { %v1844_v17 = vmul.f32 -1.442695, %v1220_v16 }
 0x3c8   : > { %v2018_v18 = vpop.f32.mrf.mxu1 }
 0x3c9   : > { %2123 = vpow2.f32 %v1844_v17 }
 0x3d6   : > { %v2124_v19 = vpop.eup %2123  ;;  %v1324_v20 = vpop.f32.mrf.mxu1 }
 0x3d7   : > { %v1235_v21 = vadd.f32 1.0, %v2124_v19 }
 0x3d8   : > { %v2037_v22 = vpop.f32.mrf.mxu1 }
 0x3d9   : > { %2125 = vrcp.f32 %v1235_v21 }
 0x3e6   : > { %v2126_v24 = vpop.eup %2125  ;;  %v1402_v25 = vpop.f32.mrf.mxu1 }
 0x3e7   : > { %2058 = vmatpush3.msra.mxu0 %v1402_v25  ;;  %v1238_v26 = vsel %vm1231_vm12, %v2126_v24, 0.0 }
 0x3e8   : > { %v2056_v27 = vpop.f32.mrf.mxu1  ;;  %v1239_v28 = vsel %vm926_vm1, %v1238_v26, 0.0  ;;  %2062 = vmatprep.subr.mxu0 %v2208_v5 }
 0x3e9   : > { %1240 = vadd.xlane.f32.xlu1 %v1239_v28 }
 0x472   : > { %v1241_v29 = vpop.xlane.xlu1 %1240 }
 0x473   : > { %vm1242_vm13 = vcmp.gt.f32.partialorder %v1241_v29, 0.0 }
 0x474   : > { %v1243_v30 = vsel %vm1242_vm13, %v1241_v29, 1.0 }
 0x475   : > { %2127 = vrcp.f32 %v1243_v30 }
 0x482   : > { %v2128_v31 = vpop.eup %2127 }
 0x483   : > { %v1245_v15 = vmul.f32 %v2128_v31, %v1238_v26 }
 0x485   : > { %1406 = vxpose.xlu0.b32.start.end [1/1] (short) (narrow) %v1245_v15, 8 }
 0x501   : > { %v1422_v32 = vpop.trf.xlu0 }
 0x502   : > { %2060 = vmatmul.mubr.msk.f32.vlgmr.msra.gmra.mxu0 %vm926_vm1, %v1422_v32 }
 0x503   : > { %2063 = vmatpush3.msra.mxu0 %v1324_v20  ;;  %2064 = vmatprep.mubr.msk.f32.mxu0 %vm2210_vm0, %v2208_v5 }
 0x504   : > { %2067 = vmatprep.subr.mxu0 %v2208_v5 }
 0x506   : > { %2065 = vmatmul.mubr.msk.f32.vlgmr.msra.gmra.mxu0 %vm926_vm1, %v1245_v15 }
 0x507   : > { %2075 = vmatprep.mubr.msk.f32.mxu0 %vm2210_vm0, %v2208_v5  ;;  %2068 = vmatpush3.msra.mxu0 %v1627_v45 }
 0x508   : > { %2069 = vmatprep.subr.mxu0 %v2208_v5 }
 0x509   : > { %2070 = vmatpush3.msra.mxu0 %v1626_v46 }
 0x50a   : > { %2071 = vmatprep.subr.mxu0 %v2208_v5 }
 0x50b   : > { %2072 = vmatpush3.msra.mxu0 %v1625_v47 }
 0x50c   : > { %2073 = vmatprep.subr.mxu0 %v2208_v5  ;;  %v1852_v5 = vld [vmem:[%s2798_s16] ss:$0 sm:$0xff] }
 0x50d   : > { %2074 = vmatpush3.msra.mxu0 %v1624_v49 }
 0x5c2   : > { %v1507_v12 = vpop.f32.mrf.mxu0 }
 0x5c4   : > { %v2061_v33 = vpop.f32.mrf.mxu0 }
 0x5c6   : > { %v1580_v34 = vpop.f32.mrf.mxu0 }
 0x5c7   : > { %v1581_v36 = vadd.f32 %v1580_v34, %v1507_v12 }
 0x5c8   : > { %v2066_v37 = vpop.f32.mrf.mxu0 }
 0x5c9   : > { %v1591_v38 = vadd.f32 %v1849_v35, %v1581_v36 }
 0x5cb   : > { %v1593_v39 = vsel %vm1592_vm14, %v1591_v38, 0.0 }
 0x5cc   : > { %1594 = vadd.xlane.f32.xlu1 %v1593_v39 }
 0x655   : > { %v1595_v40 = vpop.xlane.xlu1 %1594 }
 0x656   : > { %v1597_v41 = vmul.f32 0.03125, %v1595_v40 }
 0x658   : > { %v1598_v42 = vsub.f32 %v1591_v38, %v1597_v41 }
 0x65a   : > { %v1599_v43 = vmul.f32 %v1598_v42, %v1598_v42 }
 0x65c   : > { %v1600_v44 = vsel %vm1592_vm14, %v1599_v43, 0.0 }
 0x65d   : > { %1601 = vadd.xlane.f32.xlu0 %v1600_v44 }
 0x6e6   : > { %v1602_v50 = vpop.xlane.xlu0 %1601 }
 0x6e7   : > { %v1603_v51 = vmul.f32 0.03125, %v1602_v50 }
 0x6e9   : > { %v1604_v52 = vadd.f32 1e-05, %v1603_v51 }
 0x6eb   : > { %2129 = vrsqrt.f32 %v1604_v52 }
 0x6f8   : > { %v2130_v53 = vpop.eup %2129 }
 0x6f9   : > { %v1606_v55 = vmul.f32 %v2130_v53, %v1598_v42 }
 0x6fb   : > { %v1614_v57 = vmul.f32 %v1850_v54, %v1606_v55 }
 0x6fd   : > { %v1622_v58 = vadd.f32 %v1851_v56, %v1614_v57 }
 0x6ff   : > { %v1623_v59 = vmax.f32 %v1622_v58, 0.0 }
 0x701   : > { %2076 = vmatmul.mubr.msk.f32.vlgmr.msra.gmra.mxu0 %vm1592_vm14, %v1623_v59 }
 0x7c1   : > { %v1704_v60 = vpop.f32.mrf.mxu0 }
 0x7c2   : > { %v1705_v61 = vadd.f32 %v1852_v5, %v1704_v60 }
 0x7c3   : > { %v2077_v62 = vpop.f32.mrf.mxu0 }
 0x7c4   : > { %v1708_v63 = vadd.f32 %v1705_v61, %v2507_v48 }
 0x7c6   : > { %v1709_v0 = vmax.f32 %v1708_v63, 0.0 }
 0x7c8   : > { %1710 = vst [vmem:[%s566_s21] sm:$0xff] %v1709_v0 }
 0x7c9   : > { %2156 = shalt.err (!%p2153_p8)
}
 0x7ca   : > { %s2157_s12 = scalar_lea.hbm %s1723_s20, 128  ;;  %s2161_s1 = scalar_lea.hbm %s2824_s17, 256 }
 0x7cb   : > { %p2158_p9 = scmp.ne.s32.totalorder %s1723_s20, %s2157_s12  ;;  %p2162_p0 = scmp.lt.s32.totalorder %s1723_s20, %s2824_s17 }
 0x7cc   : > { %p2163_p1 = scmp.lt.s32.totalorder %s2161_s1, %s2157_s12 }
 0x7cd   : > { %p2159_p12 = pnand %p2158_p9, %p2346_p10 }
 0x7ce   : > { %p2164_p2 = por %p2163_p1, %p2162_p0 }
 0x7cf   : > { %p2160_p13 = pneg %p2159_p12 }
 0x7d1   : > { %p2165_p3 = pnand %p2164_p2, %p2160_p13 }
 0x7d3   : > { %2168 = shalt.err (!%p2165_p3)
}
 0x7d4   : > { %2078 = dma.vmem_to_hbm [thread:$0]  (%p2346_p10), %s1726_s9, 128, %s1723_s20, %s1712_s22  }
 0x7d5 PF: > { %s2825_s30 = sld [smem:[#allocation11_spill]] }
 0x7d6   : > { %s2826_s19 = sld [smem:[#allocation9_spill]] }
 0x7db   : > { %p2084_p4 = scmp.ge.s32.totalorder %s2825_s30, 2 }
 0x7dc   : > { %s1737_s28 = sand.u32 1, %s2826_s19  }
 0x7dd   : > { %p2081_p5 = pnand %p2084_p4, %p2350_p11  ;;  %s1738_s23 = scalar_lea.sflag [#allocation6], %s1737_s28 }
 0x7df   : > { %p2082_p6 = pneg %p2081_p5 }
 0x7e1   : > { %2188 = dma.done.wait (%p2082_p6), %s1738_s23, 128  }
 0x7e2   : > { %2190 = vsyncadd (%p2082_p6), %s1738_s23, 4294967168  ;;  %s2828_s19 = sld [smem:[#allocation12_spill]]  ;;  %s2831_s30 = smov %s2197_s18 }
 0x7e3   : > { %s2829_s29 = sld [smem:[#allocation10_spill]] }
 0x7e4   : > { %s2830_s9 = sld [smem:[#allocation13_spill]] }
 0x7e8   : > { %p35_p7 = scmp.ge.s32.totalorder %s2828_s19, 4  }
 0x7e9   : > { %s2832_s18 = smov %s2829_s29 }
 0x7ea   :  { %37 = sbr.rel (!%p35_p7) target bundleno = 28 (0x1c), region = 128 }
 0x7ef   :  { %1743 = vsyncpa [#allocation6], 1 }
 0x7f0   :  { %1745 = vsyncpa [#allocation6 + $0x1], 1 }

</bundles_post_ra>
